<compile_context>
chip_gen: v7x
topology: tpu7x:2x2x1
jax: 0.10.0
libtpu: 0.0.40
codegen_flags: <defaults>
</compile_context>

<pallas_src>
import jax
import jax.numpy as jnp
from jax import lax
from jax.experimental import pallas as pl
from jax.experimental.pallas import tpu as pltpu


def _round_up(x, m):
    return ((x + m - 1) // m) * m


def _linear_softmax_kernel(x_ref, w_ref, b_ref, o_ref):
    # x: [TB, F], w: [Cp, F], b: [Cp, 1]  ->  o: [Cp, TB]   (batch on lanes)
    logits = lax.dot_general(
        w_ref[...], x_ref[...],
        dimension_numbers=(((1,), (1,)), ((), ())),   # contract F with F (rhs-transposed,
        preferred_element_type=jnp.float32)           # same MXU form as flash-attn q@k^T)
    logits = logits + b_ref[...]
    m = jnp.max(logits, axis=0, keepdims=True)        # sublane reduce over classes
    e = jnp.exp(logits - m)                           # EUP, lane-dense (Cp x TB only)
    denom = jnp.sum(e, axis=0, keepdims=True)
    o_ref[...] = (e / denom).astype(o_ref.dtype)      # exact divide: rows sum to 1


def _linear_sigmoid_kernel(x_ref, w_ref, b_ref, o_ref):
    # x: [TB, F], w: [Cp, F], b: [Cp, 1]  ->  o: [Cp, TB]
    logits = lax.dot_general(
        w_ref[...], x_ref[...],
        dimension_numbers=(((1,), (1,)), ((), ())),
        preferred_element_type=jnp.float32)
    logits = logits + b_ref[...]
    # Numerically stable sigmoid: never exponentiates a positive number.
    z = jnp.exp(-jnp.abs(logits))
    sig = jnp.where(logits >= 0, 1.0 / (1.0 + z), z / (1.0 + z))
    o_ref[...] = sig.astype(o_ref.dtype)


def fully_weighted_model_forward(data, weight, bias, num_classes, *, tile_b=16384):
    """data:   [B, F] float32, F = num_model * num_classes
       weight: [num_classes, F]   (PyTorch nn.Linear layout, NOT transposed)
       bias:   [num_classes]
       returns softmax(data @ weight.T + bias, -1) if num_classes > 1 else sigmoid(...)."""
    B, F = data.shape
    C = num_classes
    assert weight.shape == (C, F) and bias.shape == (C,)

    # --- batch tiling -------------------------------------------------------
    # Big lane-aligned tiles to amortize per-step overhead, capped so the grid
    # has >=2 steps whenever B > 128 (keeps both v7x TensorCores busy).  No
    # jnp.pad of the activations: Pallas masks the partial trailing block.
    tile_b = max(128, min(tile_b, _round_up(pl.cdiv(B, 2), 128)))
    grid_b = pl.cdiv(B, tile_b)

    # --- pad class rows up to a sublane multiple (>= 8) ---------------------
    C_pad = _round_up(C, 8)
    if C_pad != C:
        w_p = jnp.zeros((C_pad, F), weight.dtype).at[:C, :].set(weight)
        # Padded softmax rows get a huge negative bias so exp() -> 0 and they do
        # not perturb the real normalization; sigmoid pad rows are sliced off.
        pad_val = jnp.float32(-1e30) if C > 1 else jnp.float32(0.0)
        b_p = jnp.full((C_pad,), pad_val, dtype=bias.dtype).at[:C].set(bias)
    else:
        w_p, b_p = weight, bias
    b_p = b_p.reshape(C_pad, 1)

    kernel = _linear_softmax_kernel if C > 1 else _linear_sigmoid_kernel

    cost = pl.CostEstimate(
        flops=2 * B * F * C_pad,
        transcendentals=B * C_pad,
        bytes_accessed=4 * (B * F + C_pad * F + C_pad + C_pad * B))

    out_t = pl.pallas_call(
        kernel,
        out_shape=jax.ShapeDtypeStruct((C_pad, B), jnp.float32),
        grid_spec=pltpu.PrefetchScalarGridSpec(
            num_scalar_prefetch=0,
            grid=(grid_b,),
            in_specs=[
                pl.BlockSpec((tile_b, F), lambda i: (i, 0)),   # activations (pipelined)
                pl.BlockSpec((C_pad, F), lambda i: (0, 0)),    # weight (VMEM-resident)
                pl.BlockSpec((C_pad, 1), lambda i: (0, 0)),    # bias   (VMEM-resident)
            ],
            out_specs=pl.BlockSpec((C_pad, tile_b), lambda i: (0, i)),
        ),
        compiler_params=pltpu.CompilerParams(
            dimension_semantics=("parallel",),     # batch axis shards across TCs (v7x)
            vmem_limit_bytes=48 * 1024 * 1024,     # covers double-buffered lane-padded x
        ),
        cost_estimate=cost,
    )(data, w_p, b_p)

    # Lane-dense [C_pad, B] kernel output -> module layout [B, C] (single fused
    # XLA slice+transpose pass; see TODO(synk) above about moving it in-kernel).
    return out_t[:C].T


def _reference(data, weight, bias, num_classes):
    logits = data @ weight.T + bias
    if num_classes > 1:
        return jax.nn.softmax(logits, axis=-1)
    return jax.nn.sigmoid(logits)


if __name__ == "__main__":
    key = jax.random.PRNGKey(0)
    k_data, k_w, k_b, k_w1, k_b1, k_d2 = jax.random.split(key, 6)

    # --- multi-class head: softmax path (num_classes > 1) -------------------
    num_model, num_classes, batch = 4, 8, 8
    in_features = num_model * num_classes  # 32
    bound = 1.0 / (in_features ** 0.5)
    weight = jax.random.uniform(k_w, (num_classes, in_features),
                                minval=-bound, maxval=bound, dtype=jnp.float32)
    bias = jax.random.uniform(k_b, (num_classes,),
                              minval=-bound, maxval=bound, dtype=jnp.float32)
    data = jax.random.normal(k_data, (batch, in_features), dtype=jnp.float32)

    out = jax.block_until_ready(
        fully_weighted_model_forward(data, weight, bias, num_classes))
    ref = _reference(data, weight, bias, num_classes)
    assert out.shape == (batch, num_classes)
    assert jnp.allclose(out, ref, atol=1e-3, rtol=1e-3), "softmax path mismatch"

    # --- softmax path, batch not a multiple of the tile (multi-step grid) ----
    batch2 = 200
    data2 = jax.random.normal(k_d2, (batch2, in_features), dtype=jnp.float32)
    out2 = jax.block_until_ready(
        fully_weighted_model_forward(data2, weight, bias, num_classes))
    ref2 = _reference(data2, weight, bias, num_classes)
    assert out2.shape == (batch2, num_classes)
    assert jnp.allclose(out2, ref2, atol=1e-3, rtol=1e-3), "partial-tile mismatch"

    # --- binary head: sigmoid path (num_classes == 1) ------------------------
    nm1, nc1 = 32, 1
    f1 = nm1 * nc1  # 32
    bound1 = 1.0 / (f1 ** 0.5)
    w1 = jax.random.uniform(k_w1, (nc1, f1), minval=-bound1, maxval=bound1,
                            dtype=jnp.float32)
    b1 = jax.random.uniform(k_b1, (nc1,), minval=-bound1, maxval=bound1,
                            dtype=jnp.float32)
    d1 = jax.random.normal(k_data, (batch, f1), dtype=jnp.float32)

    out1 = jax.block_until_ready(fully_weighted_model_forward(d1, w1, b1, nc1))
    ref1 = _reference(d1, w1, b1, nc1)
    assert out1.shape == (batch, nc1)
    assert jnp.allclose(out1, ref1, atol=1e-3, rtol=1e-3), "sigmoid path mismatch"

    print("KERNEL_OK")
</pallas_src>

<mosaic_0001>
module attributes {stable_mosaic.version = 11 : i64} {
  func.func @_linear_softmax_kernel(%arg0: i32, %arg1: memref<128x32xf32, #tpu.memory_space<vmem>>, %arg2: memref<8x32xf32, #tpu.memory_space<vmem>>, %arg3: memref<8x1xf32, #tpu.memory_space<vmem>>, %arg4: memref<8x128xf32, #tpu.memory_space<vmem>>) attributes {dimension_semantics = [#tpu.dimension_semantics<parallel>], iteration_bounds = array<i64: 1>, scalar_prefetch = 0 : i64, scratch_operands = 0 : i64, tpu.core_type = #tpu.core_type<tc>, window_params = [{transform_indices = @transform_0, window_bounds = array<i64: 128, 32>}, {pipeline_mode = #tpu.pipeline_mode<synchronous>, transform_indices = @transform_1, window_bounds = array<i64: 8, 32>}, {pipeline_mode = #tpu.pipeline_mode<synchronous>, transform_indices = @transform_2, window_bounds = array<i64: 8, 1>}, {transform_indices = @transform_3, window_bounds = array<i64: 8, 128>}]} {
    %c0 = arith.constant 0 : index
    %c0_0 = arith.constant 0 : index
    %0 = vector.load %arg2[%c0, %c0_0] : memref<8x32xf32, #tpu.memory_space<vmem>>, vector<8x32xf32>
    %c0_1 = arith.constant 0 : index
    %c0_2 = arith.constant 0 : index
    %1 = vector.load %arg1[%c0_1, %c0_2] : memref<128x32xf32, #tpu.memory_space<vmem>>, vector<128x32xf32>
    %cst = arith.constant dense<0.000000e+00> : vector<8x128xf32>
    %2 = tpu.matmul %0, %1, %cst {dimension_numbers = #tpu.dot_dimension_numbers<[1], [1], [0], [0], [0, 0, 1, 0], [], []>} : vector<8x32xf32>, vector<128x32xf32>, vector<8x128xf32> -> vector<8x128xf32>
    %c0_3 = arith.constant 0 : index
    %c0_4 = arith.constant 0 : index
    %3 = vector.load %arg3[%c0_3, %c0_4] : memref<8x1xf32, #tpu.memory_space<vmem>>, vector<8x1xf32>
    %4 = vector.broadcast %3 : vector<8x1xf32> to vector<8x128xf32>
    %5 = arith.addf %2, %4 : vector<8x128xf32>
    %cst_5 = arith.constant dense<0xFF800000> : vector<128xf32>
    %6 = vector.multi_reduction <maximumf>, %5, %cst_5 [0] : vector<8x128xf32> to vector<128xf32>
    %7 = vector.shape_cast %6 : vector<128xf32> to vector<1x128xf32>
    %8 = vector.broadcast %7 : vector<1x128xf32> to vector<8x128xf32>
    %9 = arith.subf %5, %8 : vector<8x128xf32>
    %10 = math.exp %9 : vector<8x128xf32>
    %cst_6 = arith.constant dense<0.000000e+00> : vector<128xf32>
    %11 = vector.multi_reduction <add>, %10, %cst_6 [0] : vector<8x128xf32> to vector<128xf32>
    %12 = vector.shape_cast %11 : vector<128xf32> to vector<1x128xf32>
    %13 = vector.broadcast %12 : vector<1x128xf32> to vector<8x128xf32>
    %14 = arith.divf %10, %13 : vector<8x128xf32>
    %c0_7 = arith.constant 0 : index
    %c0_8 = arith.constant 0 : index
    %15 = vector.load %arg4[%c0_7, %c0_8] : memref<8x128xf32, #tpu.memory_space<vmem>>, vector<8x128xf32>
    tpu.vector_store %arg4[%c0_7, %c0_8], %14 {strides = array<i32>} : memref<8x128xf32, #tpu.memory_space<vmem>>, vector<8x128xf32>,
    return
  }
  func.func @transform_0(%arg0: i32) -> (i32, i32) {
    %c0_i32 = arith.constant 0 : i32
    %c0_i32_0 = arith.constant 0 : i32
    return %arg0, %c0_i32 : i32, i32
  }
  func.func @transform_1(%arg0: i32) -> (i32, i32) {
    %c0_i32 = arith.constant 0 : i32
    %c0_i32_0 = arith.constant 0 : i32
    %c0_i32_1 = arith.constant 0 : i32
    return %c0_i32, %c0_i32_0 : i32, i32
  }
  func.func @transform_2(%arg0: i32) -> (i32, i32) {
    %c0_i32 = arith.constant 0 : i32
    %c0_i32_0 = arith.constant 0 : i32
    %c0_i32_1 = arith.constant 0 : i32
    return %c0_i32, %c0_i32_0 : i32, i32
  }
  func.func @transform_3(%arg0: i32) -> (i32, i32) {
    %c0_i32 = arith.constant 0 : i32
    %c0_i32_0 = arith.constant 0 : i32
    return %c0_i32, %arg0 : i32, i32
  }
}

</mosaic_0001>

<bundles_post_ra>
// kernel: tpu_custom_call.1
= control target key start
LH: loop header
LB: loop body
LE: loop exit
PB: predicated region body
PF: predicated region fallthrough
CT: control target
= control target key end

     0   :  { %8 = vsyncpa [#allocation3], 0  ;;  %s489_s0 = inlined_call_operand.vmem [shape: f32[8,32], index: 0, kind: input, shape index: {}]   ;;  %s490_s1 = inlined_call_operand.hbm [shape: f32[8,32], index: 1, kind: input, shape index: {}]   ;;  %s491_s2 = inlined_call_operand.vmem [shape: f32[8,1], index: 2, kind: input, shape index: {}]   ;;  %s492_s3 = inlined_call_operand.hbm [shape: f32[8,8], index: 3, kind: output, shape index: {}]  }
   0x1   :  { %9 = vsyncpa [#allocation4], 0  ;;  %s365_s12 = smov [#allocation2]   ;;  %s317_s16 = scalar_lea.hbm %s490_s1, 128 }
   0x2   :  { %s18_s13 = sshll.u32 %s365_s12, 4  ;;  %p318_p0 = scmp.ne.s32.totalorder %s490_s1, %s317_s16  ;;  %s19_s13 = int_to_ptr.vmem [resolvable:$true] %s18_s13 }
   0x3   :  { %p321_p1 = scmp.lt.u32.totalorder %s317_s16, %s490_s1 }
   0x5   :  { %p323_p2 = pnand %p321_p1, %p318_p0 }
   0x7   :  { %326 = shalt.err (!%p323_p2)
}
   0x8   :  { %s327_s21 = scalar_lea.vmem %s19_s13, 128  ;;  %p332_p4 = scmp.lt.s32.totalorder %s19_s13, %s19_s13 }
   0x9   :  { %p328_p3 = scmp.ne.s32.totalorder %s19_s13, %s327_s21  ;;  %p333_p5 = scmp.lt.s32.totalorder %s327_s21, %s327_s21 }
   0xb   :  { %p334_p6 = por %p333_p5, %p332_p4 }
   0xd   :  { %p335_p7 = pnand %p334_p6, %p328_p3 }
   0xf   :  { %338 = shalt.err (!%p335_p7)
}
  0x10   :  { %21 = dma.hbm_to_vmem [thread:$0]  %s490_s1, 128, %s19_s13, [#allocation3]  }
  0x11   :  { %361 = dma.done.wait [#allocation3], 128  }
  0x12   :  { %362 = vsyncadd [#allocation3], 4294967168  ;;  %v366_v0 = vmov 0.0|0.0   ;;  %vm367_vm0 = vmmov 0   ;;  %v368_v1 = vmov 0.0   ;;  %v369_v2 = vmov 0  }
  0x13   :  { %274 = vmatprep.subr.bf16.mxu0 %v366_v0  ;;  %271 = vmatprep.mubr.msk.f32.mxu0 %vm367_vm0, %v368_v1  ;;  %vm50_vm1 = vcmask 261120   ;;  %v28_v3 = vld [vmem:[%s489_s0] sm:$0xff]  ;;  %v29_v4 = vld [vmem:[%s489_s0 + $0x8] sm:$0xff]  ;;  %v30_v7 = vld [vmem:[%s489_s0 + $0x10] sm:$0xff] }
  0x14   :  { %312 = vset.pattern.permute.xlu0 %v369_v2  ;;  %vm411_vm2 = vmpackc.low %vm50_vm1, %vm50_vm1  ;;  %v275_v6 = vpack.c.bf16 %v29_v4, %v28_v3  ;;  %v31_v8 = vld [vmem:[%s489_s0 + $0x18] sm:$0xff]  ;;  %v44_v9 = vld [vmem:[%s491_s2] sm:$0xff] }
  0x15   :  { %47 = vperm.xlu0 %312, %v44_v9   ;;  %v279_v10 = vpack.c.bf16 %v31_v8, %v30_v7  ;;  %v32_v11 = vld [vmem:[%s489_s0 + $0x20] sm:$0xff]  ;;  %v33_v12 = vld [vmem:[%s489_s0 + $0x28] sm:$0xff]  ;;  %v34_v14 = vld [vmem:[%s489_s0 + $0x30] sm:$0xff] }
  0x16   :  { %277 = vmatpush3.bf16.xpose.msk.msra.mxu0 %vm411_vm2, %v275_v6  ;;  %v283_v13 = vpack.c.bf16 %v33_v12, %v32_v11  ;;  %v35_v15 = vld [vmem:[%s489_s0 + $0x38] sm:$0xff]  ;;  %v36_v17 = vld [vmem:[%s489_s0 + $0x40] sm:$0xff]  ;;  %v37_v18 = vld [vmem:[%s489_s0 + $0x48] sm:$0xff] }
  0x17   :  { %278 = vmatprep.subr.bf16.mxu0 %v366_v0  ;;  %v287_v16 = vpack.c.bf16 %v35_v15, %v34_v14  ;;  %v291_v19 = vpack.c.bf16 %v37_v18, %v36_v17  ;;  %v38_v20 = vld [vmem:[%s489_s0 + $0x50] sm:$0xff]  ;;  %v39_v21 = vld [vmem:[%s489_s0 + $0x58] sm:$0xff]  ;;  %v40_v23 = vld [vmem:[%s489_s0 + $0x60] sm:$0xff] }
  0x18   :  { %v295_v22 = vpack.c.bf16 %v39_v21, %v38_v20  ;;  %v41_v24 = vld [vmem:[%s489_s0 + $0x68] sm:$0xff]  ;;  %v42_v26 = vld [vmem:[%s489_s0 + $0x70] sm:$0xff]  ;;  %v43_v27 = vld [vmem:[%s489_s0 + $0x78] sm:$0xff]  ;;  %s370_s0 = smov [#allocation5]  }
  0x19   :  { %v299_v25 = vpack.c.bf16 %v41_v24, %v40_v23  ;;  %v303_v28 = vpack.c.bf16 %v43_v27, %v42_v26  ;;  %v27_v29 = vld [vmem:[#allocation2] sm:$0xff]  ;;  %s196_s28 = sshll.u32 %s370_s0, 4  ;;  %s197_s28 = int_to_ptr.vmem [resolvable:$true] %s196_s28 }
  0x1a   :  { %s339_s29 = scalar_lea.vmem %s197_s28, 128  ;;  %p344_p9 = scmp.lt.s32.totalorder %s197_s28, %s197_s28 }
  0x1b   :  { %p340_p8 = scmp.ne.s32.totalorder %s197_s28, %s339_s29  ;;  %p345_p10 = scmp.lt.s32.totalorder %s339_s29, %s339_s29 }
  0x1d   :  { %p346_p11 = por %p345_p10, %p344_p9 }
  0x1e   :  { %281 = vmatpush3.bf16.xpose.msk.msra.mxu0 %vm411_vm2, %v279_v10 }
  0x1f   :  { %282 = vmatprep.subr.bf16.mxu0 %v366_v0  ;;  %p347_p12 = pnand %p346_p11, %p340_p8 }
  0x26   :  { %285 = vmatpush3.bf16.xpose.msk.msra.mxu0 %vm411_vm2, %v283_v13 }
  0x27   :  { %286 = vmatprep.subr.bf16.mxu0 %v366_v0 }
  0x2e   :  { %289 = vmatpush3.bf16.xpose.msk.msra.mxu0 %vm411_vm2, %v287_v16 }
  0x2f   :  { %290 = vmatprep.subr.bf16.mxu0 %v366_v0 }
  0x36   :  { %293 = vmatpush3.bf16.xpose.msk.msra.mxu0 %vm411_vm2, %v291_v19 }
  0x37   :  { %294 = vmatprep.subr.bf16.mxu0 %v366_v0 }
  0x3e   :  { %297 = vmatpush3.bf16.xpose.msk.msra.mxu0 %vm411_vm2, %v295_v22 }
  0x3f   :  { %298 = vmatprep.subr.bf16.mxu0 %v366_v0 }
  0x46   :  { %301 = vmatpush3.bf16.xpose.msk.msra.mxu0 %vm411_vm2, %v299_v25 }
  0x47   :  { %302 = vmatprep.subr.bf16.mxu0 %v366_v0 }
  0x4e   :  { %305 = vmatpush3.bf16.xpose.msk.msra.mxu0 %vm411_vm2, %v303_v28 }
  0x55   :  { %272 = vmatmul.mubr.msk.f32.vlgmr.msra.gmra.mrb[0].mxu0 %vm50_vm1, %v27_v29 }
  0x94   :  { %v48_v30 = vpop.permute.xlu0 %47 }
 0x128   :  { %v168_v31 = vpop.f32.mrb[0].mxu0 }
 0x129   :  { %v169_v32 = vadd.f32 %v168_v31, %v48_v30  ;;  %v273_v33 = vpop.f32.mrb[1].mxu0 }
 0x12b   :  { %v172_v34 = vrot.slane %v169_v32, 4 }
 0x12d   :  { %v173_v35 = vmax.f32 %v169_v32, %v172_v34 }
 0x12f   :  { %v174_v36 = vrot.slane %v173_v35, 2 }
 0x131   :  { %v175_v37 = vmax.f32 %v173_v35, %v174_v36 }
 0x133   :  { %v176_v38 = vrot.slane %v175_v37, 1 }
 0x135   :  { %v177_v39 = vmax.f32 %v175_v37, %v176_v38 }
 0x137   :  { %v178_v40 = vsub.f32 %v169_v32, %v177_v39 }
 0x139   :  { %v179_v41 = vmul.f32 1.442695, %v178_v40 }
 0x13b   :  { %313 = vpow2.f32 %v179_v41 }
 0x145   :  { %v314_v42 = vpop.eup %313 }
 0x146   :  { %v181_v43 = vrot.slane %v314_v42, 4 }
 0x148   :  { %v182_v44 = vadd.f32 %v314_v42, %v181_v43 }
 0x14a   :  { %v183_v45 = vrot.slane %v182_v44, 2 }
 0x14c   :  { %v184_v46 = vadd.f32 %v183_v45, %v182_v44 }
 0x14e   :  { %v185_v47 = vrot.slane %v184_v46, 1 }
 0x150   :  { %v186_v48 = vadd.f32 %v185_v47, %v184_v46 }
 0x152   :  { %315 = vrcp.f32 %v186_v48 }
 0x15c   :  { %v316_v49 = vpop.eup %315 }
 0x15d   :  { %v188_v50 = vmul.f32 %v316_v49, %v314_v42 }
 0x15f   :  { %189 = vst [vmem:[#allocation5] sm:$0xff] %v188_v50 }
 0x160   :  { %350 = shalt.err (!%p347_p12)
}
 0x161   :  { %s351_s5 = scalar_lea.hbm %s492_s3, 128 }
 0x162   :  { %p352_p13 = scmp.ne.s32.totalorder %s492_s3, %s351_s5  ;;  %p355_p0 = scmp.lt.u32.totalorder %s351_s5, %s492_s3 }
 0x164   :  { %p357_p1 = pnand %p355_p0, %p352_p13 }
 0x166   :  { %360 = shalt.err (!%p357_p1)
}
 0x167   :  { %199 = dma.vmem_to_hbm [thread:$0]  %s197_s28, 128, %s492_s3, [#allocation4]  }
 0x168   :  { %363 = dma.done.wait [#allocation4], 128  }
 0x169   :  { %364 = vsyncadd [#allocation4], 4294967168 }
 0x16a   :  { %203 = vsyncpa [#allocation3], 1 }
 0x16b   :  { %204 = vsyncpa [#allocation4], 1 }

</bundles_post_ra>
